<compile_context>
chip_gen: v5e
topology: v5e:2x2
jax: 0.10.0
libtpu: 0.0.40
codegen_flags: <defaults>
</compile_context>

<pallas_src>
import functools
import math

import jax
import jax.numpy as jnp
from jax.experimental import pallas as pl
from jax.experimental.pallas import tpu as pltpu


def _rmsnorm_kernel(x_ref, w_ref, o_ref, *, eps, inv_dim):
    # Upcast to f32 (matches x.float() in the reference).
    x = x_ref[...].astype(jnp.float32)
    # mean(x^2) over the last dim (static 1/dim, no padded lanes involved).
    ms = jnp.sum(x * x, axis=-1, keepdims=True) * inv_dim
    normed = x * jax.lax.rsqrt(ms + eps)
    # .type_as(x), then * weight (promotes like PyTorch), then cast to out dtype.
    y = normed.astype(x_ref.dtype) * w_ref[...]
    o_ref[...] = y.astype(o_ref.dtype)


def _sublane_multiple(dtype) -> int:
    # f32 -> 8, bf16/f16 -> 16, int8/fp8 -> 32 rows per packed vreg.
    itemsize = jnp.dtype(dtype).itemsize
    return max(8, 32 // max(1, itemsize))


def _vmem_capacity_bytes() -> int:
    try:
        return int(pltpu.get_tpu_info().vmem_capacity_bytes)
    except Exception:
        pass
    try:
        kind = jax.devices()[0].device_kind.lower()
        if "v5" in kind or "v6" in kind:
            return 128 << 20
    except Exception:
        pass
    return 64 << 20  # conservative (v7x per-TC VMEM)


@functools.partial(jax.jit, static_argnames=("eps", "block_rows", "out_dtype"))
def rmsnorm(x, weight, *, eps: float = 1e-6, block_rows=None, out_dtype=None):
    """x: [..., dim], weight: [dim]. Returns RMSNorm(x) * weight.

    out_dtype=None keeps PyTorch's promotion (result_type(x, weight)); pass e.g.
    jnp.bfloat16 to halve write bytes on this bandwidth-bound kernel.
    """
    orig_shape = x.shape
    dim = orig_shape[-1]
    rows = math.prod(orig_shape[:-1]) if len(orig_shape) > 1 else 1

    if out_dtype is None:
        out_dtype = jnp.result_type(x.dtype, weight.dtype)
    out_dtype = jnp.dtype(out_dtype)

    if rows == 0 or dim == 0:
        return jnp.zeros(orig_shape, out_dtype)

    x_item = jnp.dtype(x.dtype).itemsize
    o_item = out_dtype.itemsize
    w_item = jnp.dtype(weight.dtype).itemsize

    sub = max(_sublane_multiple(x.dtype), _sublane_multiple(out_dtype))
    vmem_cap = _vmem_capacity_bytes()
    # Combined per-step tile target (x tile + out tile): larger on 128 MiB-VMEM
    # chips (v5e/v6e), smaller on 64 MiB-VMEM chips (v7x).
    target_tile_bytes = (20 << 20) if vmem_cap >= (100 << 20) else (10 << 20)

    bytes_per_row = dim * (x_item + o_item)
    if block_rows is None:
        br = max(sub, (target_tile_bytes // bytes_per_row) // sub * sub)
    else:
        br = max(sub, (int(block_rows) // sub) * sub)

    if rows < sub:
        # Block second-last dim == full array dim is always legal.
        br = rows
    else:
        br = min(br, (rows // sub) * sub)
        if rows >= 2 * sub:
            # Ensure the 1-D grid has >= 2 steps so both v7x TensorCores get work
            # (near-free on v5e/v6e: ~0.35 us extra per-step overhead).
            half = ((rows // 2) // sub) * sub
            br = min(br, half)

    grid = pl.cdiv(rows, br)

    x2 = x.reshape(rows, dim)
    w2 = weight.reshape(1, dim)

    # VMEM budget: double-buffered x/out tiles + single weight buffer + headroom.
    x_tile_b = br * dim * x_item
    o_tile_b = br * dim * o_item
    needed = 2 * (x_tile_b + o_tile_b) + dim * w_item + (2 << 20)
    vmem_limit = int(min(max(needed, 32 << 20), max(32 << 20, vmem_cap - (16 << 20))))

    cost = pl.CostEstimate(
        flops=3 * rows * dim,
        transcendentals=rows,
        bytes_accessed=rows * dim * (x_item + o_item) + dim * w_item,
    )

    kernel = functools.partial(_rmsnorm_kernel, eps=float(eps), inv_dim=1.0 / float(dim))

    out = pl.pallas_call(
        kernel,
        out_shape=jax.ShapeDtypeStruct((rows, dim), out_dtype),
        grid_spec=pltpu.PrefetchScalarGridSpec(
            num_scalar_prefetch=0,
            grid=(grid,),
            in_specs=[
                pl.BlockSpec((br, dim), lambda i: (i, 0)),   # x row tile
                pl.BlockSpec((1, dim), lambda i: (0, 0)),    # weight (resident)
            ],
            out_specs=pl.BlockSpec((br, dim), lambda i: (i, 0)),
        ),
        compiler_params=pltpu.CompilerParams(
            dimension_semantics=("parallel",),
            vmem_limit_bytes=vmem_limit,
        ),
        cost_estimate=cost,
    )(x2, w2)

    return out.reshape(orig_shape)


def rmsnorm_ref(x, weight, eps=1e-6):
    xf = x.astype(jnp.float32)
    ms = jnp.mean(xf * xf, axis=-1, keepdims=True)
    normed = (xf * jax.lax.rsqrt(ms + eps)).astype(x.dtype)
    return normed * weight


if __name__ == "__main__":
    key = jax.random.PRNGKey(0)
    k1, k2, k3, k4 = jax.random.split(key, 4)

    # --- Test 1: module-default init (weight = ones), f32, small hidden ------
    batch, seq, hidden = 2, 8, 32
    x = jax.random.normal(k1, (batch, seq, hidden), dtype=jnp.float32)
    weight = jnp.ones((hidden,), dtype=jnp.float32)  # RMSNorm.__init__: ones(dim)

    out = rmsnorm(x, weight, eps=1e-6)
    jax.block_until_ready(out)
    ref = rmsnorm_ref(x, weight, eps=1e-6)
    assert out.shape == x.shape
    assert out.dtype == ref.dtype
    assert jnp.allclose(out, ref, atol=1e-5, rtol=1e-5), "f32 mismatch vs reference"

    # --- Test 2: bf16 activations, f32 weight (PyTorch promotion -> f32 out) -
    hidden2 = 256
    xb = jax.random.normal(k2, (2, 16, hidden2), dtype=jnp.bfloat16)
    wb = jax.random.normal(k3, (hidden2,), dtype=jnp.float32)

    outb = rmsnorm(xb, wb, eps=1e-6)
    jax.block_until_ready(outb)
    refb = rmsnorm_ref(xb, wb, eps=1e-6)
    assert outb.shape == xb.shape
    assert outb.dtype == refb.dtype
    assert jnp.allclose(outb.astype(jnp.float32), refb.astype(jnp.float32),
                        atol=2e-2, rtol=2e-2), "bf16 mismatch vs reference"

    # --- Test 2b: optional bf16 output (halves write bytes; deviates from torch)
    outc = rmsnorm(xb, wb, eps=1e-6, out_dtype=jnp.bfloat16)
    jax.block_until_ready(outc)
    assert outc.dtype == jnp.bfloat16
    assert jnp.allclose(outc.astype(jnp.float32), refb.astype(jnp.float32),
                        atol=1e-1, rtol=5e-2), "bf16-out mismatch vs reference"

    # --- Test 3: ragged rows (not multiple of block) + non-128 hidden dim -----
    xr = jax.random.normal(k4, (3, 7, 96), dtype=jnp.float32)
    wr = jnp.ones((96,), dtype=jnp.float32) * 0.5
    outr = rmsnorm(xr, wr, eps=1e-6)
    jax.block_until_ready(outr)
    refr = rmsnorm_ref(xr, wr, eps=1e-6)
    assert outr.shape == xr.shape
    assert jnp.allclose(outr, refr, atol=1e-5, rtol=1e-5), "ragged mismatch vs reference"

    print("KERNEL_OK")
</pallas_src>

<mosaic_0001>
module attributes {stable_mosaic.version = 11 : i64} {
  func.func @_rmsnorm_kernel(%arg0: i32, %arg1: memref<8x32xf32, #tpu.memory_space<vmem>>, %arg2: memref<1x32xf32, #tpu.memory_space<vmem>>, %arg3: memref<8x32xf32, #tpu.memory_space<vmem>>) attributes {dimension_semantics = [#tpu.dimension_semantics<parallel>], iteration_bounds = array<i64: 2>, scalar_prefetch = 0 : i64, scratch_operands = 0 : i64, tpu.core_type = #tpu.core_type<tc>, window_params = [{transform_indices = @transform_0, window_bounds = array<i64: 8, 32>}, {pipeline_mode = #tpu.pipeline_mode<synchronous>, transform_indices = @transform_1, window_bounds = array<i64: 1, 32>}, {transform_indices = @transform_2, window_bounds = array<i64: 8, 32>}]} {
    %c0 = arith.constant 0 : index
    %c0_0 = arith.constant 0 : index
    %0 = vector.load %arg1[%c0, %c0_0] : memref<8x32xf32, #tpu.memory_space<vmem>>, vector<8x32xf32>
    %1 = arith.mulf %0, %0 : vector<8x32xf32>
    %cst = arith.constant dense<0.000000e+00> : vector<8xf32>
    %2 = vector.multi_reduction <add>, %1, %cst [1] : vector<8x32xf32> to vector<8xf32>
    %3 = vector.shape_cast %2 : vector<8xf32> to vector<8x1xf32>
    %cst_1 = arith.constant 3.125000e-02 : f32
    %4 = vector.broadcast %cst_1 : f32 to vector<8x1xf32>
    %5 = arith.mulf %3, %4 : vector<8x1xf32>
    %cst_2 = arith.constant 9.99999997E-7 : f32
    %6 = vector.broadcast %cst_2 : f32 to vector<8x1xf32>
    %7 = arith.addf %5, %6 : vector<8x1xf32>
    %8 = math.rsqrt %7 : vector<8x1xf32>
    %9 = vector.broadcast %8 : vector<8x1xf32> to vector<8x32xf32>
    %10 = arith.mulf %0, %9 : vector<8x32xf32>
    %c0_3 = arith.constant 0 : index
    %c0_4 = arith.constant 0 : index
    %11 = vector.load %arg2[%c0_3, %c0_4] : memref<1x32xf32, #tpu.memory_space<vmem>>, vector<1x32xf32>
    %12 = vector.broadcast %11 : vector<1x32xf32> to vector<8x32xf32>
    %13 = arith.mulf %10, %12 : vector<8x32xf32>
    %c0_5 = arith.constant 0 : index
    %c0_6 = arith.constant 0 : index
    %14 = vector.load %arg3[%c0_5, %c0_6] : memref<8x32xf32, #tpu.memory_space<vmem>>, vector<8x32xf32>
    tpu.vector_store %arg3[%c0_5, %c0_6], %13 {strides = array<i32>} : memref<8x32xf32, #tpu.memory_space<vmem>>, vector<8x32xf32>,
    return
  }
  func.func @transform_0(%arg0: i32) -> (i32, i32) {
    %c0_i32 = arith.constant 0 : i32
    %c0_i32_0 = arith.constant 0 : i32
    return %arg0, %c0_i32 : i32, i32
  }
  func.func @transform_1(%arg0: i32) -> (i32, i32) {
    %c0_i32 = arith.constant 0 : i32
    %c0_i32_0 = arith.constant 0 : i32
    %c0_i32_1 = arith.constant 0 : i32
    return %c0_i32, %c0_i32_0 : i32, i32
  }
  func.func @transform_2(%arg0: i32) -> (i32, i32) {
    %c0_i32 = arith.constant 0 : i32
    %c0_i32_0 = arith.constant 0 : i32
    return %arg0, %c0_i32 : i32, i32
  }
}

</mosaic_0001>

<bundles_post_ra>
// kernel: rmsnorm.1
= control target key start
LH: loop header
LB: loop body
LE: loop exit
PB: predicated region body
PF: predicated region fallthrough
CT: control target
= control target key end

     0   :  { %7 = vsyncpa [#allocation3], 0  ;;  %s578_s0 = inlined_call_operand.hbm [shape: f32[16,32], index: 0, kind: input, shape index: {}]   ;;  %s579_s1 = inlined_call_operand.vmem [shape: f32[1,32], index: 1, kind: input, shape index: {}]   ;;  %s580_s2 = inlined_call_operand.hbm [shape: f32[16,32], index: 2, kind: output, shape index: {}]  }
   0x1   :  { %9 = vsyncpa [#allocation3 + $0x1], 0 }
   0x2   :  { %10 = vsyncpa [#allocation4], 0 }
   0x3   :  { %12 = vsyncpa [#allocation4 + $0x1], 0  ;;  %s446_s9 = smov 0   ;;  %s448_s10 = smov 0  }
   0x4   :  { %s450_s11 = smov 0   ;;  %s452_s12 = smov 0  }
   0x5 LB: > { %s467_s13 = sadd.s32 4294967295, %s429_s12   ;;  %s272_s14 = sadd.s32 4294967294, %s429_s12   ;;  %s429_s12 = sphi %s452_s12, %s590_s12   ;;  %s425_s11 = sphi %s450_s11, %s589_s11   ;;  %s421_s10 = sphi %s448_s10, %s588_s10   ;;  %s417_s9 = sphi %s446_s9, %s587_s9  }
   0x6   : > { %s471_s15 = sadd.s32 1, %s429_s12   ;;  %s25_s16 = sadd.s32 1, %s425_s11 }
   0x7   : > { %s22_s17 = ssub.s32 %s429_s12, %s471_s15  ;;  %p32_p0 = scmp.ne.s32.totalorder %s425_s11, %s421_s10 }
   0x8   : > { %p23_p1 = scmp.eq.s32.totalorder %s22_s17, 0  ;;  %p33_p2 = scmp.eq.s32.totalorder %s429_s12, 0 }
   0x9   : > { %p38_p3 = scmp.ne.s32.totalorder %s421_s10, %s417_s9  ;;  %p39_p4 = scmp.eq.s32.totalorder %s467_s13, 0 }
   0xa   : > { %s483_s18 = scalar_select %p23_p1, %s425_s11, %s25_s16  }
   0xb   : > { %p485_p5 = por %p33_p2, %p32_p0  ;;  %p489_p6 = por %p39_p4, %p38_p3 }
   0xc   : > { %p83_p7 = scmp.eq.s32.totalorder %s467_s13, 1  ;;  %p89_p8 = scmp.eq.s32.totalorder %s272_s14, 1 }
   0xd   : > { %p296_p10 = scmp.lt.s32.totalorder %s429_s12, 2  ;;  %s112_s23 = sand.u32 1, %s425_s11  }
   0xe   : > { %p496_p11 = por %p83_p7, %p32_p0  ;;  %p500_p12 = por %p89_p8, %p38_p3 }
   0xf   : > { %s276_s24 = sshll.u32 %s429_s12, 3  ;;  %s275_s25 = sshll.u32 %s112_s23, 3 }
  0x10   : > { %s120_s28 = scalar_lea.hbm %s578_s0, %s276_s24  ;;  %s116_s30 = scalar_lea.vmem [#allocation2], %s275_s25 }
  0x11   : > { %s122_s29 = sshll.u32 %s120_s28, 4  ;;  %s124_s3 = sshll.u32 %s116_s30, 4  ;;  %s123_s29 = int_to_ptr.hbm [resolvable:$true] %s122_s29  ;;  %s125_s3 = int_to_ptr.vmem [resolvable:$true] %s124_s3 }
  0x12   : > { %p511_p13 = pnand %p296_p10, %p485_p5  ;;  %p277_p0 = scmp.ge.s32.totalorder %s429_s12, 1 }
  0x13   : > { %p129_p1 = scmp.lt.s32.totalorder %s429_s12, 3  ;;  %s113_s5 = scalar_lea.sflag [#allocation3], %s112_s23 }
  0x14   : > { %s333_s6 = sshra.s32 %s123_s29, 4  ;;  %p337_p3 = pneg %p511_p13  ;;  %s334_s6 = int_to_ptr.hbm [resolvable:$true] %s333_s6 }
  0x15   : > { %s335_s7 = scalar_lea.hbm %s334_s6, 8  ;;  %s340_s16 = scalar_lea.hbm %s578_s0, 16 }
  0x16   : > { %p336_p2 = scmp.ne.s32.totalorder %s334_s6, %s335_s7  ;;  %p341_p5 = scmp.lt.s32.totalorder %s334_s6, %s578_s0 }
  0x17   : > { %p342_p8 = scmp.lt.s32.totalorder %s340_s16, %s335_s7 }
  0x18   : > { %p338_p4 = pnand %p337_p3, %p336_p2 }
  0x19   : > { %p343_p10 = por %p342_p8, %p341_p5 }
  0x1a   : > { %p339_p7 = pneg %p338_p4 }
  0x1c   : > { %p344_p9 = pnand %p343_p10, %p339_p7 }
  0x1e   : > { %347 = shalt.err (!%p344_p9)
}
  0x1f   : > { %291 = dma.hbm_to_vmem [thread:$0]  (!%p511_p13), %s123_s29, 128, %s125_s3, %s113_s5  }
  0x20   : > { %p130_p2 = pnand %p277_p0, %p129_p1 }
  0x21   : > { %s532_s23 = sand.u32 (!%p130_p2), 1, %s421_s10  }
  0x22   : > { %133 = sbr.rel (%p130_p2) target bundleno = 189 (0xbd), region = 28  ;;  %s278_s24 = sshll.u32 (!%p130_p2), %s532_s23, 3 }
  0x23   : > { %s136_s25 = scalar_lea.sflag (!%p130_p2), [#allocation3], %s532_s23  ;;  %s139_s26 = scalar_lea.vmem (!%p130_p2), [#allocation2], %s278_s24 }
  0x27   : > { %408 = dma.done.wait (%p489_p6), %s136_s25, 128  }
  0x28   : > { %410 = vsyncadd (%p489_p6), %s136_s25, 4294967168  ;;  %v161_v0 = vld [vmem:[%s139_s26] sm:$0xff]  ;;  %vm163_vm0 = vcmask 261120   ;;  %s281_s27 = sshll.u32 %s467_s13, 3  ;;  %s160_s4 = scalar_lea.vmem [#allocation5], %s278_s24 }
  0x29   : > { %v162_v1 = vmul.f32 %v161_v0, %v161_v0  ;;  %s197_s29 = scalar_lea.hbm %s580_s2, %s281_s27  ;;  %v330_v12 = vld [vmem:[%s579_s1] ss:$0 sm:$0xff]  ;;  %s199_s5 = sshll.u32 %s160_s4, 4  ;;  %s200_s5 = int_to_ptr.vmem [resolvable:$true] %s199_s5 }
  0x2a   : > { %s201_s6 = sshll.u32 %s197_s29, 4  ;;  %s187_s13 = scalar_lea.sflag [#allocation4], %s532_s23  ;;  %s202_s6 = int_to_ptr.hbm [resolvable:$true] %s201_s6 }
  0x2b   : > { %v164_v2 = vsel %vm163_vm0, %v162_v1, 0.0  ;;  %s377_s7 = sshra.s32 %s202_s6, 4  ;;  %s383_s17 = scalar_lea.hbm %s580_s2, 16  ;;  %s378_s7 = int_to_ptr.hbm [resolvable:$true] %s377_s7 }
  0x2c   : > { %165 = vadd.xlane.f32.xlu0 %v164_v2  ;;  %s379_s8 = scalar_lea.hbm %s378_s7, 8  ;;  %p384_p0 = scmp.lt.s32.totalorder %s378_s7, %s580_s2 }
  0x2d   : > { %p380_p6 = scmp.ne.s32.totalorder %s378_s7, %s379_s8  ;;  %p385_p1 = scmp.lt.s32.totalorder %s383_s17, %s379_s8 }
  0x2f   : > { %p381_p9 = pnand %p380_p6, %p496_p11  ;;  %p386_p3 = por %p385_p1, %p384_p0 }
  0x31   : > { %p382_p13 = pneg %p381_p9 }
  0x33   : > { %p387_p4 = pnand %p386_p3, %p382_p13 }
  0x9f   : > { %v166_v3 = vpop.xlane.xlu0 %165 }
  0xa0   : > { %v167_v4 = vmul.f32 0.03125, %v166_v3 }
  0xa2   : > { %v168_v5 = vadd.f32 1e-06, %v167_v4 }
  0xa4   : > { %331 = vrsqrt.f32 %v168_v5  ;;  %vm175_vm2 = vweird.f32 %v168_v5 }
  0xaa   : > { %v332_v6 = vpop.eup %331 }
  0xab   : > { %v170_v7 = vmul.f32 %v332_v6, %v168_v5  ;;  %vm176_vm1 = vweird.f32 %v332_v6 }
  0xac   : > { %vm177_vm3 = vmor %vm175_vm2, %vm176_vm1 }
  0xad   : > { %v171_v8 = vmul.f32 %v332_v6, %v170_v7 }
  0xaf   : > { %v172_v9 = vmul.f32 0.5, %v171_v8 }
  0xb1   : > { %v173_v10 = vsub.f32 1.5, %v172_v9 }
  0xb3   : > { %v174_v11 = vmul.f32 %v332_v6, %v173_v10 }
  0xb5   : > { %v178_v13 = vsel %vm177_vm3, %v332_v6, %v174_v11 }
  0xb6   : > { %v179_v14 = vmul.f32 %v178_v13, %v161_v0 }
  0xb8   : > { %v184_v15 = vmul.f32 %v330_v12, %v179_v14 }
  0xba   : > { %185 = vst.msk [vmem:[%s160_s4] sm:$0xff] %vm163_vm0, %v184_v15 }
  0xbb   : > { %390 = shalt.err (!%p387_p4)
}
  0xbc   : > { %286 = dma.vmem_to_hbm [thread:$0]  (%p496_p11), %s200_s5, 128, %s202_s6, %s187_s13  }
  0xbd PF: > { %s213_s23 = sand.u32 1, %s417_s9   ;;  %p586_p7 = scmp.ge.s32.totalorder %s429_s12, 2 }
  0xbe   : > { %s214_s25 = scalar_lea.sflag [#allocation4], %s213_s23 }
  0xbf   : > { %p293_p5 = pnand %p586_p7, %p500_p12 }
  0xc1   : > { %p294_p8 = pneg %p293_p5 }
  0xc3   : > { %412 = dma.done.wait (%p294_p8), %s214_s25, 128  }
  0xc4   : > { %414 = vsyncadd (%p294_p8), %s214_s25, 4294967168  ;;  %p15_p10 = scmp.ge.s32.totalorder %s471_s15, 4   ;;  %s587_s9 = smov %s421_s10 }
  0xc5   : > { %s588_s10 = smov %s425_s11  ;;  %s589_s11 = smov %s483_s18 }
  0xc6   : > { %s590_s12 = smov %s471_s15  ;;  %17 = sbr.rel (!%p15_p10) target bundleno = 5 (0x5), region = 73 }
  0xcb   :  { %220 = vsyncpa [#allocation3], 1 }
  0xcc   :  { %222 = vsyncpa [#allocation3 + $0x1], 1 }
  0xcd   :  { %223 = vsyncpa [#allocation4], 1 }
  0xce   :  { %225 = vsyncpa [#allocation4 + $0x1], 1 }

</bundles_post_ra>
